<compile_context>
chip_gen: v6e
topology: v6e:2x2x1
jax: 0.10.0
libtpu: 0.0.40
codegen_flags: <defaults>
</compile_context>

<pallas_src>
import functools

import jax
import jax.numpy as jnp
from jax.experimental import pallas as pl
from jax.experimental.pallas import tpu as pltpu


# ----------------------------- small helpers --------------------------------

def _cdiv(a, b):
    return -(-a // b)


def _round_up(n, m):
    return ((n + m - 1) // m) * m


def _sublane(dtype):
    # Sublane packing granularity of the second-minor dim per dtype width.
    return {1: 32, 2: 16}.get(jnp.dtype(dtype).itemsize, 8)


def _device_kind():
    try:
        return jax.devices()[0].device_kind.lower()
    except Exception:
        return ""


def _device_vmem_bytes():
    try:
        return int(pltpu.get_tpu_info().vmem_capacity_bytes)
    except Exception:
        return (64 << 20) if "v7" in _device_kind() else (128 << 20)


def _auto_tile_m():
    kind = _device_kind()
    if "v6" in kind:
        return 1024     # crossover ~650 flops/B, 128 MiB VMEM
    if "v7" in kind:
        return 512      # crossover ~310 flops/B, only 64 MiB VMEM
    return 512          # v5e crossover ~240 flops/B; safe generic default


def _vmem_estimate(tm, th, Dp, w_isz, x_isz):
    # Double-buffered input/output streams + f32 accumulator + matmul temps.
    ins = 2 * (tm * Dp * x_isz + (Dp * 2 * th + th * Dp) * w_isz)
    outs = 2 * tm * Dp * x_isz
    acc = tm * Dp * 4
    tmp = tm * 2 * th * 4 + tm * th * w_isz
    return ins + outs + acc + tmp


# ------------------------------- the kernel ---------------------------------

def _ffn_kernel(x_ref, w13_ref, w2_ref, o_ref, acc_ref):
    """One (m-tile, h-tile) step of the SwiGLU FFN.

    x_ref   : (tm, Dp)        activation tile
    w13_ref : (Dp, 2*th)      fused [w1_tile_k | w3_tile_k]
    w2_ref  : (th, Dp)        down-projection tile
    o_ref   : (tm, Dp)        output tile (resident across the h axis)
    acc_ref : (tm, Dp) f32    accumulator scratch
    """
    k = pl.program_id(1)

    @pl.when(k == 0)
    def _():
        acc_ref[...] = jnp.zeros_like(acc_ref)

    # No-op cast when activation and weight dtypes already match.
    x = x_ref[...].astype(w13_ref.dtype)
    h13 = jnp.dot(x, w13_ref[...], preferred_element_type=jnp.float32)

    th = h13.shape[1] // 2          # static; slice is on a 128-lane boundary
    h1 = h13[:, :th]
    h3 = h13[:, th:]

    # SiLU in f32 (sigmoid -> EUP, hidden under the MXU); one downcast.
    h = (h1 * jax.nn.sigmoid(h1) * h3).astype(w2_ref.dtype)

    acc_ref[...] += jnp.dot(h, w2_ref[...], preferred_element_type=jnp.float32)

    @pl.when(k == pl.num_programs(1) - 1)
    def _():
        o_ref[...] = acc_ref[...].astype(o_ref.dtype)


# ------------------------- one-time weight repack ----------------------------

def prepare_ffn_weights(w1, w3, w2, *, tile_h=512, compute_dtype=None):
    """One-time weight repack; call at parameter-init time, NOT per forward.

    w1, w3: (D, H); w2: (H, D), stored (in, out) == nn.Linear .weight.T.
    Zero padding is exactly neutral for this computation.  Returns
    (w13, w2p, meta) where w13 columns are [w1_tile_k | w3_tile_k] per h-tile.
    `compute_dtype=jnp.bfloat16` is recommended for f32 models on v5e/v6e.
    """
    D, H = w1.shape
    if compute_dtype is not None:
        w1 = w1.astype(compute_dtype)
        w3 = w3.astype(compute_dtype)
        w2 = w2.astype(compute_dtype)

    th = min(tile_h, _round_up(H, 128))
    Dp = _round_up(D, 128)
    Hp = _round_up(H, th)
    n_k = Hp // th

    w1p = jnp.pad(w1, ((0, Dp - D), (0, Hp - H)))
    w3p = jnp.pad(w3, ((0, Dp - D), (0, Hp - H)))
    w2p = jnp.pad(w2, ((0, Hp - H), (0, Dp - D)))

    w13 = jnp.concatenate(
        [w1p.reshape(Dp, n_k, th), w3p.reshape(Dp, n_k, th)], axis=2
    ).reshape(Dp, n_k * 2 * th)

    meta = dict(D=D, H=H, Dp=Dp, Hp=Hp, th=th, n_k=n_k)
    return w13, w2p, meta


# --------------------------------- forward -----------------------------------

@functools.partial(jax.jit, static_argnames=("D", "th", "tile_m"))
def feed_forward_fused(x, w13, w2p, *, D, th, tile_m=None):
    """x: (B, S, D); w13/w2p from prepare_ffn_weights.  Returns (B, S, D)."""
    B, S, _ = x.shape
    M = B * S
    dt = x.dtype
    Dp = w2p.shape[1]
    n_k = w2p.shape[0] // th

    if tile_m is None:
        tile_m = _auto_tile_m()

    # Balanced M tiling: pad only up to sublane granularity, not tile_m.
    sub = _sublane(dt)
    n_m = _cdiv(M, tile_m)
    tm = _round_up(_cdiv(M, n_m), sub)

    # Shrink the m tile until the double-buffered working set fits VMEM
    # (important on v7x's 64 MiB); th is fixed by the fused weight layout.
    device_vmem = _device_vmem_bytes()
    budget = device_vmem - (6 << 20)
    w_isz = jnp.dtype(w13.dtype).itemsize
    x_isz = jnp.dtype(dt).itemsize
    while _vmem_estimate(tm, th, Dp, w_isz, x_isz) > budget and tile_m > sub:
        tile_m = max(tile_m // 2, sub)
        n_m = _cdiv(M, tile_m)
        tm = _round_up(_cdiv(M, n_m), sub)
    Mp = n_m * tm

    # Per-call work is activations only; weights were repacked once.
    x2d = jnp.pad(x.reshape(M, D), ((0, Mp - M), (0, Dp - D)))

    est = _vmem_estimate(tm, th, Dp, w_isz, x_isz)
    vmem_limit = int(min(max(est + (4 << 20), 32 << 20),
                         device_vmem - (2 << 20)))

    out2d = pl.pallas_call(
        _ffn_kernel,
        out_shape=jax.ShapeDtypeStruct((Mp, Dp), dt),
        grid_spec=pltpu.PrefetchScalarGridSpec(
            num_scalar_prefetch=0,
            grid=(n_m, n_k),
            in_specs=[
                pl.BlockSpec((tm, Dp), lambda i, k: (i, 0)),       # x tile
                pl.BlockSpec((Dp, 2 * th), lambda i, k: (0, k)),   # [w1_k|w3_k]
                pl.BlockSpec((th, Dp), lambda i, k: (k, 0)),       # w2 tile
            ],
            out_specs=pl.BlockSpec((tm, Dp), lambda i, k: (i, 0)),
            scratch_shapes=[pltpu.VMEM((tm, Dp), jnp.float32)],
        ),
        compiler_params=pltpu.CompilerParams(
            dimension_semantics=("parallel", "arbitrary"),
            vmem_limit_bytes=vmem_limit,
        ),
    )(x2d, w13, w2p)

    return out2d[:M, :D].reshape(B, S, D)


def feed_forward(x, w1, w3, w2, *, tile_h=512, tile_m=None, compute_dtype=None):
    """Convenience one-shot wrapper (repacks weights; prefer the 2-step flow)."""
    w13, w2p, meta = prepare_ffn_weights(
        w1, w3, w2, tile_h=tile_h, compute_dtype=compute_dtype)
    return feed_forward_fused(x, w13, w2p, D=meta["D"], th=meta["th"],
                              tile_m=tile_m)


def _reference(x, w1, w3, w2):
    h1 = x @ w1
    h3 = x @ w3
    return (h1 * jax.nn.sigmoid(h1) * h3) @ w2


if __name__ == "__main__":
    # Small config consistent with the module:
    #   dim = 32, multiple_of = 32
    #   hidden_dim = multiple_of * ceil((2 * 4 * dim / 3) / multiple_of) = 96
    #   dropout = 0.0  -> identity
    B, S, dim = 2, 8, 32
    multiple_of = 32
    hidden_dim = 4 * dim
    hidden_dim = int(2 * hidden_dim / 3)
    hidden_dim = multiple_of * ((hidden_dim + multiple_of - 1) // multiple_of)

    key = jax.random.PRNGKey(0)
    kx, k1, k2, k3 = jax.random.split(key, 4)

    x = jax.random.normal(kx, (B, S, dim), dtype=jnp.float32)
    # Weights stored (in, out): equivalent to nn.Linear weights transposed.
    w1 = jax.random.normal(k1, (dim, hidden_dim), dtype=jnp.float32) / jnp.sqrt(dim)
    w3 = jax.random.normal(k3, (dim, hidden_dim), dtype=jnp.float32) / jnp.sqrt(dim)
    w2 = jax.random.normal(k2, (hidden_dim, dim), dtype=jnp.float32) / jnp.sqrt(hidden_dim)

    # One-time weight repack (hoisted out of the per-call path).
    w13, w2p, meta = prepare_ffn_weights(w1, w3, w2)
    w13, w2p = jax.block_until_ready((w13, w2p))

    # Forward: per-call work touches activations only.
    out = feed_forward_fused(x, w13, w2p, D=meta["D"], th=meta["th"])
    out = jax.block_until_ready(out)

    # Second call reuses the already-fused weights (no repack).
    out2 = jax.block_until_ready(
        feed_forward_fused(x, w13, w2p, D=meta["D"], th=meta["th"]))

    ref = _reference(x, w1, w3, w2)
    assert out.shape == (B, S, dim)
    assert jnp.allclose(out, ref, atol=1e-3, rtol=1e-3), "mismatch vs reference"
    assert jnp.allclose(out2, ref, atol=1e-3, rtol=1e-3), "mismatch on 2nd call"

    print("KERNEL_OK")
</pallas_src>

<mosaic_0001>
module attributes {stable_mosaic.version = 11 : i64} {
  func.func @_ffn_kernel(%arg0: i32, %arg1: i32, %arg2: memref<16x128xf32, #tpu.memory_space<vmem>>, %arg3: memref<128x256xf32, #tpu.memory_space<vmem>>, %arg4: memref<128x128xf32, #tpu.memory_space<vmem>>, %arg5: memref<16x128xf32, #tpu.memory_space<vmem>>, %arg6: memref<16x128xf32, #tpu.memory_space<vmem>>) attributes {dimension_semantics = [#tpu.dimension_semantics<parallel>, #tpu.dimension_semantics<arbitrary>], iteration_bounds = array<i64: 1, 1>, scalar_prefetch = 0 : i64, scratch_operands = 1 : i64, tpu.core_type = #tpu.core_type<tc>, window_params = [{transform_indices = @transform_0, window_bounds = array<i64: 16, 128>}, {transform_indices = @transform_1, window_bounds = array<i64: 128, 256>}, {transform_indices = @transform_2, window_bounds = array<i64: 128, 128>}, {transform_indices = @transform_3, window_bounds = array<i64: 16, 128>}]} {
    %c0_i32 = arith.constant 0 : i32
    %0 = arith.cmpi eq, %arg1, %c0_i32 : i32
    %1 = arith.extui %0 : i1 to i32
    %c0_i32_0 = arith.constant 0 : i32
    %2 = arith.cmpi ne, %1, %c0_i32_0 : i32
    scf.if %2 {
      %cst_14 = arith.constant 0.000000e+00 : f32
      %23 = vector.broadcast %cst_14 : f32 to vector<16x128xf32>
      %c0_15 = arith.constant 0 : index
      %c0_16 = arith.constant 0 : index
      %24 = vector.load %arg6[%c0_15, %c0_16] : memref<16x128xf32, #tpu.memory_space<vmem>>, vector<16x128xf32>
      tpu.vector_store %arg6[%c0_15, %c0_16], %23 {strides = array<i32>} : memref<16x128xf32, #tpu.memory_space<vmem>>, vector<16x128xf32>,
    } else {
    }
    %c0 = arith.constant 0 : index
    %c0_1 = arith.constant 0 : index
    %3 = vector.load %arg2[%c0, %c0_1] : memref<16x128xf32, #tpu.memory_space<vmem>>, vector<16x128xf32>
    %c0_2 = arith.constant 0 : index
    %c0_3 = arith.constant 0 : index
    %4 = vector.load %arg3[%c0_2, %c0_3] : memref<128x256xf32, #tpu.memory_space<vmem>>, vector<128x256xf32>
    %cst = arith.constant dense<0.000000e+00> : vector<16x256xf32>
    %5 = tpu.matmul %3, %4, %cst {dimension_numbers = #tpu.dot_dimension_numbers<[1], [0], [0], [1], [0, 0, 1, 1], [], []>} : vector<16x128xf32>, vector<128x256xf32>, vector<16x256xf32> -> vector<16x256xf32>
    %6 = vector.extract_strided_slice %5 {offsets = [0, 0], sizes = [16, 128], strides = [1, 1]} : vector<16x256xf32> to vector<16x128xf32>
    %7 = vector.extract_strided_slice %5 {offsets = [0, 128], sizes = [16, 128], strides = [1, 1]} : vector<16x256xf32> to vector<16x128xf32>
    %8 = arith.negf %6 : vector<16x128xf32>
    %9 = math.exp %8 : vector<16x128xf32>
    %cst_4 = arith.constant 1.000000e+00 : f32
    %10 = vector.broadcast %cst_4 : f32 to vector<16x128xf32>
    %11 = arith.addf %10, %9 : vector<16x128xf32>
    %12 = arith.divf %10, %11 : vector<16x128xf32>
    %13 = arith.mulf %6, %12 : vector<16x128xf32>
    %14 = arith.mulf %13, %7 : vector<16x128xf32>
    %c0_5 = arith.constant 0 : index
    %c0_6 = arith.constant 0 : index
    %15 = vector.load %arg6[%c0_5, %c0_6] : memref<16x128xf32, #tpu.memory_space<vmem>>, vector<16x128xf32>
    %c0_7 = arith.constant 0 : index
    %c0_8 = arith.constant 0 : index
    %16 = vector.load %arg4[%c0_7, %c0_8] : memref<128x128xf32, #tpu.memory_space<vmem>>, vector<128x128xf32>
    %cst_9 = arith.constant dense<0.000000e+00> : vector<16x128xf32>
    %17 = tpu.matmul %14, %16, %cst_9 {dimension_numbers = #tpu.dot_dimension_numbers<[1], [0], [0], [1], [0, 0, 1, 1], [], []>} : vector<16x128xf32>, vector<128x128xf32>, vector<16x128xf32> -> vector<16x128xf32>
    %18 = arith.addf %15, %17 : vector<16x128xf32>
    %c0_10 = arith.constant 0 : index
    %c0_11 = arith.constant 0 : index
    %19 = vector.load %arg6[%c0_10, %c0_11] : memref<16x128xf32, #tpu.memory_space<vmem>>, vector<16x128xf32>
    tpu.vector_store %arg6[%c0_10, %c0_11], %18 {strides = array<i32>} : memref<16x128xf32, #tpu.memory_space<vmem>>, vector<16x128xf32>,
    %c0_i32_12 = arith.constant 0 : i32
    %20 = arith.cmpi eq, %arg1, %c0_i32_12 : i32
    %21 = arith.extui %20 : i1 to i32
    %c0_i32_13 = arith.constant 0 : i32
    %22 = arith.cmpi ne, %21, %c0_i32_13 : i32
    scf.if %22 {
      %c0_14 = arith.constant 0 : index
      %c0_15 = arith.constant 0 : index
      %23 = vector.load %arg6[%c0_14, %c0_15] : memref<16x128xf32, #tpu.memory_space<vmem>>, vector<16x128xf32>
      %c0_16 = arith.constant 0 : index
      %c0_17 = arith.constant 0 : index
      %24 = vector.load %arg5[%c0_16, %c0_17] : memref<16x128xf32, #tpu.memory_space<vmem>>, vector<16x128xf32>
      tpu.vector_store %arg5[%c0_16, %c0_17], %23 {strides = array<i32>} : memref<16x128xf32, #tpu.memory_space<vmem>>, vector<16x128xf32>,
    } else {
    }
    return
  }
  func.func @transform_0(%arg0: i32, %arg1: i32) -> (i32, i32) {
    %c0_i32 = arith.constant 0 : i32
    %c0_i32_0 = arith.constant 0 : i32
    return %arg0, %c0_i32 : i32, i32
  }
  func.func @transform_1(%arg0: i32, %arg1: i32) -> (i32, i32) {
    %c0_i32 = arith.constant 0 : i32
    %c0_i32_0 = arith.constant 0 : i32
    return %c0_i32, %arg1 : i32, i32
  }
  func.func @transform_2(%arg0: i32, %arg1: i32) -> (i32, i32) {
    %c0_i32 = arith.constant 0 : i32
    %c0_i32_0 = arith.constant 0 : i32
    return %arg1, %c0_i32 : i32, i32
  }
  func.func @transform_3(%arg0: i32, %arg1: i32) -> (i32, i32) {
    %c0_i32 = arith.constant 0 : i32
    %c0_i32_0 = arith.constant 0 : i32
    return %arg0, %c0_i32 : i32, i32
  }
}

</mosaic_0001>

<bundles_post_ra>
// kernel: feed_forward_fused.1
= control target key start
LH: loop header
LB: loop body
LE: loop exit
PB: predicated region body
PF: predicated region fallthrough
CT: control target
= control target key end

     0   :  { %8 = vsyncpa [#allocation4], 0  ;;  %s446_s0 = inlined_call_operand.vmem [shape: f32[16,128], index: 0, kind: input, shape index: {}]   ;;  %s447_s1 = inlined_call_operand.hbm [shape: f32[128,256], index: 1, kind: input, shape index: {}]   ;;  %s448_s2 = inlined_call_operand.hbm [shape: f32[128,128], index: 2, kind: input, shape index: {}]   ;;  %s449_s3 = inlined_call_operand.vmem [shape: f32[16,128], index: 3, kind: output, shape index: {}]  }
   0x1   :  { %9 = vsyncpa [#allocation6], 0  ;;  %s399_s12 = smov [#allocation3]  }
   0x2   :  { %s17_s13 = sshll.u32 %s399_s12, 4  ;;  %s18_s13 = int_to_ptr.vmem [resolvable:$true] %s17_s13 }
   0x3   :  { %s363_s14 = scalar_lea.vmem %s18_s13, 4096  ;;  %p368_p1 = scmp.lt.s32.totalorder %s18_s13, %s18_s13 }
   0x4   :  { %p364_p0 = scmp.ne.s32.totalorder %s18_s13, %s363_s14  ;;  %p369_p2 = scmp.lt.s32.totalorder %s363_s14, %s363_s14 }
   0x6   :  { %p370_p3 = por %p369_p2, %p368_p1 }
   0x8   :  { %p371_p4 = pnand %p370_p3, %p364_p0 }
   0xa   :  { %374 = shalt.err (!%p371_p4)
}
   0xb   :  { %s400_s15 = smov 256   ;;  %s401_s16 = smov 16  }
   0xc   :  { %23 = dma.hbm_to_vmem [thread:$0]  %s447_s1, 4096, %s18_s13, [#allocation4], %s400_s15, %s400_s15, %s401_s16  }
   0xd   :  { %s402_s19 = smov [#allocation5]  }
   0xe   :  { %s29_s20 = sshll.u32 %s402_s19, 4  ;;  %s30_s20 = int_to_ptr.vmem [resolvable:$true] %s29_s20 }
   0xf   :  { %s383_s21 = scalar_lea.vmem %s30_s20, 2048  ;;  %p388_p6 = scmp.lt.s32.totalorder %s30_s20, %s30_s20 }
  0x10   :  { %p384_p5 = scmp.ne.s32.totalorder %s30_s20, %s383_s21  ;;  %p389_p7 = scmp.lt.s32.totalorder %s383_s21, %s383_s21 }
  0x12   :  { %p390_p8 = por %p389_p7, %p388_p6 }
  0x14   :  { %p391_p9 = pnand %p390_p8, %p384_p5 }
  0x16   :  { %394 = shalt.err (!%p391_p9)
}
  0x17   :  { %s403_s22 = smov 128   ;;  %s404_s23 = smov 8  }
  0x18   :  { %35 = dma.hbm_to_vmem [thread:$0]  %s448_s2, 2048, %s30_s20, [#allocation6], %s403_s22, %s403_s22, %s404_s23  }
  0x19   :  { %395 = dma.done.wait [#allocation4], 4096  }
  0x1a   :  { %396 = vsyncadd [#allocation4], 4294963200 }
  0x1b   :  { %397 = dma.done.wait [#allocation6], 2048  }
  0x1c   :  { %398 = vsyncadd [#allocation6], 4294965248  ;;  %v405_v0 = vmov 0.0   ;;  %v81_v1 = vld [vmem:[#allocation3 + $0xf8] sm:$0xff]  ;;  %v80_v2 = vld [vmem:[#allocation3 + $0xf0] sm:$0xff] }
  0x1d   :  { %146 = vmatprep.mubr.f32.mxu0 %v405_v0  ;;  %v79_v3 = vld [vmem:[#allocation3 + $0xe8] sm:$0xff]  ;;  %82 = vmatprep.subr.mxu0 %v81_v1  ;;  %v78_v4 = vld [vmem:[#allocation3 + $0xe0] sm:$0xff]  ;;  %v77_v5 = vld [vmem:[#allocation3 + $0xd8] sm:$0xff] }
  0x1e   :  { %83 = vmatpush1.msra.mxu0 %v80_v2  ;;  %v76_v6 = vld [vmem:[#allocation3 + $0xd0] sm:$0xff]  ;;  %v75_v7 = vld [vmem:[#allocation3 + $0xc8] sm:$0xff]  ;;  %v74_v8 = vld [vmem:[#allocation3 + $0xc0] sm:$0xff] }
  0x1f   :  { %84 = vmatprep.subr.mxu0 %v79_v3  ;;  %v73_v9 = vld [vmem:[#allocation3 + $0xb8] sm:$0xff]  ;;  %v72_v10 = vld [vmem:[#allocation3 + $0xb0] sm:$0xff]  ;;  %v71_v11 = vld [vmem:[#allocation3 + $0xa8] sm:$0xff] }
  0x20   :  { %85 = vmatpush1.msra.mxu0 %v78_v4  ;;  %v70_v12 = vld [vmem:[#allocation3 + $0xa0] sm:$0xff]  ;;  %v69_v13 = vld [vmem:[#allocation3 + $0x98] sm:$0xff]  ;;  %v68_v14 = vld [vmem:[#allocation3 + $0x90] sm:$0xff] }
  0x21   :  { %86 = vmatprep.subr.mxu0 %v77_v5  ;;  %v67_v15 = vld [vmem:[#allocation3 + $0x88] sm:$0xff]  ;;  %v66_v16 = vld [vmem:[#allocation3 + $0x80] sm:$0xff]  ;;  %v65_v17 = vld [vmem:[#allocation3 + $0x78] sm:$0xff] }
  0x22   :  { %87 = vmatpush1.msra.mxu0 %v76_v6  ;;  %v64_v18 = vld [vmem:[#allocation3 + $0x70] sm:$0xff]  ;;  %v63_v19 = vld [vmem:[#allocation3 + $0x68] sm:$0xff]  ;;  %v62_v20 = vld [vmem:[#allocation3 + $0x60] sm:$0xff] }
  0x23   :  { %88 = vmatprep.subr.mxu0 %v75_v7  ;;  %v61_v21 = vld [vmem:[#allocation3 + $0x58] sm:$0xff]  ;;  %v60_v22 = vld [vmem:[#allocation3 + $0x50] sm:$0xff]  ;;  %v59_v23 = vld [vmem:[#allocation3 + $0x48] sm:$0xff] }
  0x24   :  { %89 = vmatpush1.msra.mxu0 %v74_v8  ;;  %v58_v24 = vld [vmem:[#allocation3 + $0x40] sm:$0xff]  ;;  %v57_v25 = vld [vmem:[#allocation3 + $0x38] sm:$0xff]  ;;  %v56_v26 = vld [vmem:[#allocation3 + $0x30] sm:$0xff] }
  0x25   :  { %90 = vmatprep.subr.mxu0 %v73_v9  ;;  %v55_v27 = vld [vmem:[#allocation3 + $0x28] sm:$0xff]  ;;  %v54_v28 = vld [vmem:[#allocation3 + $0x20] sm:$0xff]  ;;  %v53_v29 = vld [vmem:[#allocation3 + $0x18] sm:$0xff] }
  0x26   :  { %91 = vmatpush1.msra.mxu0 %v72_v10  ;;  %v52_v30 = vld [vmem:[#allocation3 + $0x10] sm:$0xff]  ;;  %v51_v31 = vld [vmem:[#allocation3 + $0x8] sm:$0xff]  ;;  %v50_v32 = vld [vmem:[#allocation3] sm:$0xff] }
  0x27   :  { %92 = vmatprep.subr.mxu0 %v71_v11  ;;  %v48_v33 = vld [vmem:[%s446_s0] sm:$0xff]  ;;  %v49_v34 = vld [vmem:[%s446_s0 + $0x8] sm:$0xff]  ;;  %v192_v35 = vld [vmem:[#allocation5 + $0x78] sm:$0xff] }
  0x28   :  { %93 = vmatpush1.msra.mxu0 %v70_v12  ;;  %305 = vmatprep.subr.mxu1 %v192_v35  ;;  %v191_v36 = vld [vmem:[#allocation5 + $0x70] sm:$0xff]  ;;  %v190_v37 = vld [vmem:[#allocation5 + $0x68] sm:$0xff]  ;;  %v189_v38 = vld [vmem:[#allocation5 + $0x60] sm:$0xff] }
  0x29   :  { %94 = vmatprep.subr.mxu0 %v69_v13  ;;  %306 = vmatpush3.msra.mxu1 %v192_v35  ;;  %v188_v39 = vld [vmem:[#allocation5 + $0x58] sm:$0xff]  ;;  %v187_v40 = vld [vmem:[#allocation5 + $0x50] sm:$0xff]  ;;  %v186_v41 = vld [vmem:[#allocation5 + $0x48] sm:$0xff] }
  0x2a   :  { %95 = vmatpush1.msra.mxu0 %v68_v14  ;;  %307 = vmatprep.subr.mxu1 %v191_v36  ;;  %v185_v42 = vld [vmem:[#allocation5 + $0x40] sm:$0xff]  ;;  %v184_v43 = vld [vmem:[#allocation5 + $0x38] sm:$0xff]  ;;  %v183_v44 = vld [vmem:[#allocation5 + $0x30] sm:$0xff] }
  0x2b   :  { %96 = vmatprep.subr.mxu0 %v67_v15  ;;  %308 = vmatpush3.msra.mxu1 %v191_v36  ;;  %v182_v45 = vld [vmem:[#allocation5 + $0x28] sm:$0xff]  ;;  %v181_v46 = vld [vmem:[#allocation5 + $0x20] sm:$0xff]  ;;  %v180_v47 = vld [vmem:[#allocation5 + $0x18] sm:$0xff] }
  0x2c   :  { %97 = vmatpush1.msra.mxu0 %v66_v16  ;;  %309 = vmatprep.subr.mxu1 %v190_v37  ;;  %v179_v48 = vld [vmem:[#allocation5 + $0x10] sm:$0xff]  ;;  %v178_v49 = vld [vmem:[#allocation5 + $0x8] sm:$0xff]  ;;  %v177_v50 = vld [vmem:[#allocation5] sm:$0xff] }
  0x2d   :  { %98 = vmatprep.subr.mxu0 %v65_v17  ;;  %310 = vmatpush3.msra.mxu1 %v190_v37 }
  0x2e   :  { %99 = vmatpush1.msra.mxu0 %v64_v18  ;;  %311 = vmatprep.subr.mxu1 %v189_v38 }
  0x2f   :  { %100 = vmatprep.subr.mxu0 %v63_v19  ;;  %312 = vmatpush3.msra.mxu1 %v189_v38 }
  0x30   :  { %101 = vmatpush1.msra.mxu0 %v62_v20  ;;  %313 = vmatprep.subr.mxu1 %v188_v39 }
  0x31   :  { %102 = vmatprep.subr.mxu0 %v61_v21  ;;  %314 = vmatpush3.msra.mxu1 %v188_v39 }
  0x32   :  { %103 = vmatpush1.msra.mxu0 %v60_v22  ;;  %315 = vmatprep.subr.mxu1 %v187_v40 }
  0x33   :  { %104 = vmatprep.subr.mxu0 %v59_v23  ;;  %316 = vmatpush3.msra.mxu1 %v187_v40 }
  0x34   :  { %105 = vmatpush1.msra.mxu0 %v58_v24  ;;  %317 = vmatprep.subr.mxu1 %v186_v41 }
  0x35   :  { %106 = vmatprep.subr.mxu0 %v57_v25  ;;  %318 = vmatpush3.msra.mxu1 %v186_v41 }
  0x36   :  { %107 = vmatpush1.msra.mxu0 %v56_v26  ;;  %319 = vmatprep.subr.mxu1 %v185_v42 }
  0x37   :  { %108 = vmatprep.subr.mxu0 %v55_v27  ;;  %320 = vmatpush3.msra.mxu1 %v185_v42 }
  0x38   :  { %109 = vmatpush1.msra.mxu0 %v54_v28  ;;  %321 = vmatprep.subr.mxu1 %v184_v43 }
  0x39   :  { %110 = vmatprep.subr.mxu0 %v53_v29  ;;  %322 = vmatpush3.msra.mxu1 %v184_v43 }
  0x3a   :  { %111 = vmatpush1.msra.mxu0 %v52_v30  ;;  %323 = vmatprep.subr.mxu1 %v183_v44 }
  0x3b   :  { %112 = vmatprep.subr.mxu0 %v51_v31  ;;  %324 = vmatpush3.msra.mxu1 %v183_v44 }
  0x3c   :  { %113 = vmatpush1.msra.mxu0 %v50_v32  ;;  %325 = vmatprep.subr.mxu1 %v182_v45 }
  0x3d   :  { %147 = vmatmul.mubr.f32.vlgmr.msra.gmra.mxu0 %v48_v33  ;;  %326 = vmatpush3.msra.mxu1 %v182_v45 }
  0x3e   :  { %152 = vmatprep.mubr.f32.mxu0 %v405_v0  ;;  %327 = vmatprep.subr.mxu1 %v181_v46 }
  0x3f   :  { %328 = vmatpush3.msra.mxu1 %v181_v46 }
  0x40   :  { %329 = vmatprep.subr.mxu1 %v180_v47 }
  0x41   :  { %153 = vmatmul.mubr.f32.gmra.mxu0 %v49_v34  ;;  %330 = vmatpush3.msra.mxu1 %v180_v47 }
  0x42   :  { %331 = vmatprep.subr.mxu1 %v179_v48 }
  0x43   :  { %332 = vmatpush3.msra.mxu1 %v179_v48 }
  0x44   :  { %333 = vmatprep.subr.mxu1 %v178_v49 }
  0x45   :  { %334 = vmatpush3.msra.mxu1 %v178_v49 }
  0x46   :  { %335 = vmatprep.subr.mxu1 %v177_v50 }
  0x47   :  { %336 = vmatpush3.msra.mxu1 %v177_v50 }
  0xfd   :  { %v148_v51 = vpop.f32.mrf.mxu0 }
  0xfe   :  { %v285_v52 = vmul.f32 -1.442695, %v148_v51 }
  0xff   :  { %v150_v53 = vpop.f32.mrf.mxu0 }
 0x100   :  { %347 = vpow2.f32 %v285_v52 }
 0x101   :  { %v154_v54 = vpop.f32.mrf.mxu0 }
 0x102   :  { %v286_v55 = vmul.f32 -1.442695, %v154_v54 }
 0x103   :  { %v156_v1 = vpop.f32.mrf.mxu0 }
 0x104   :  { %349 = vpow2.f32 %v286_v55 }
 0x10d   :  { %v348_v56 = vpop.eup %347 }
 0x10e   :  { %v165_v57 = vadd.f32 1.0, %v348_v56 }
 0x110   :  { %351 = vrcp.f32 %v165_v57 }
 0x111   :  { %v350_v58 = vpop.eup %349 }
 0x112   :  { %v166_v59 = vadd.f32 1.0, %v350_v58 }
 0x114   :  { %353 = vrcp.f32 %v166_v59 }
 0x11d   :  { %v352_v60 = vpop.eup %351 }
 0x11e   :  { %v171_v61 = vmul.f32 %v352_v60, %v148_v51 }
 0x120   :  { %v173_v62 = vmul.f32 %v171_v61, %v150_v53 }
 0x121   :  { %v354_v63 = vpop.eup %353 }
 0x122   :  { %v172_v0 = vmul.f32 %v354_v63, %v154_v54  ;;  %337 = vmatprep.mubr.f32.mxu1 %v173_v62 }
 0x124   :  { %v174_v2 = vmul.f32 %v172_v0, %v156_v1 }
 0x126   :  { %338 = vmatmul.mubr.f32.vlgmr.msra.gmra.mxu1 %v174_v2 }
 0x1e6   :  { %v339_v3 = vpop.f32.mrf.mxu1 }
 0x1e7   :  { %278 = vst [vmem:[%s449_s3 + $0x8] sm:$0xff] %v339_v3 }
 0x1e8   :  { %v259_v4 = vpop.f32.mrf.mxu1 }
 0x1e9   :  { %277 = vst [vmem:[%s449_s3] sm:$0xff] %v259_v4 }
 0x1ea   :  { %283 = vsyncpa [#allocation4], 1 }
 0x1eb   :  { %284 = vsyncpa [#allocation6], 1 }

</bundles_post_ra>
